<compile_context>
chip_gen: v7x
topology: tpu7x:2x2x1
jax: 0.10.0
libtpu: 0.0.40
codegen_flags: <defaults>
</compile_context>

<pallas_src>
import functools

import jax
import jax.numpy as jnp
from jax import lax
from jax.experimental import pallas as pl
from jax.experimental.pallas import tpu as pltpu

EPS = 1e-5  # PyTorch BatchNorm2d default eps


def _pair(v):
    return (v, v) if isinstance(v, int) else tuple(v)


def _round_up(x, m):
    return ((x + m - 1) // m) * m


# ------------------------------ Pallas kernel -------------------------------

def _conv_bn_relu_kernel(x_ref, w_ref, s_ref, b_ref, o_ref, acc_ref, *,
                         Kh, sh, TH):
    """One grid step = one (batch, row-block): TH output rows x Wo_p x Cout_p.

    x_ref  : (1, sh, TH+DH, Wo_p, Kw*Cin)  bf16  width-unfolded, row-phased,
                                                 row-blocked input (halo incl.)
    w_ref  : (Kh, Kw*Cin, Cout_p)          bf16  per-tap-row weight slabs
    s_ref  : (1, Cout_p)                   f32   folded BN scale
    b_ref  : (1, Cout_p)                   f32   folded BN bias (incl. conv bias)
    o_ref  : (1, TH, Wo_p, Cout_p)         f32 (or bf16)
    acc_ref: (TH*Wo_p, Cout_p)             f32   VMEM scratch accumulator
    """
    wo_p = x_ref.shape[3]
    k = x_ref.shape[4]
    m = TH * wo_p

    # Kh MXU dots: M = TH*Wo_p, K = Kw*Cin, N = Cout_p, one shared accumulator.
    for i in range(Kh):
        pi, di = i % sh, i // sh                       # row phase / row offset
        a = x_ref[0, pi, di:di + TH, :, :].reshape(m, k)        # (M, K) bf16
        contrib = jnp.dot(a, w_ref[i], preferred_element_type=jnp.float32)
        if i == 0:
            acc_ref[...] = contrib
        else:
            acc_ref[...] += contrib

    # Folded BatchNorm + ReLU epilogue; single lane-dense full-tile store.
    y = jnp.maximum(acc_ref[...] * s_ref[...] + b_ref[...], 0.0)
    o_ref[0] = y.reshape(TH, wo_p, o_ref.shape[-1]).astype(o_ref.dtype)


# ------------------------------ host wrapper --------------------------------

def conv_bn_relu(x, w, scale, bias, stride, padding,
                 target_out_elems=128 * 1024, out_dtype=jnp.float32):
    """Fused Conv2d + per-channel scale/bias + ReLU.  NCHW in / NCHW out."""
    B, Cin, H, W = x.shape
    Cout, Cin2, Kh, Kw = w.shape
    assert Cin == Cin2
    sh, sw = _pair(stride)
    ph, pw = _pair(padding)
    Ho = (H + 2 * ph - Kh) // sh + 1
    Wo = (W + 2 * pw - Kw) // sw + 1
    assert Ho > 0 and Wo > 0

    Cout_p = _round_up(Cout, 128)        # lane-dense output / full MXU columns
    Wo_p = _round_up(Wo, 16)             # bf16 sublane tile (16, 128)
    K = Kw * Cin                         # MXU contraction depth per tap row

    # Rows per grid step: ~0.5 MiB of output per step to amortize step cost,
    # while keeping all per-step blocks well under the default scoped VMEM.
    TH = max(1, min(Ho, target_out_elems // (Wo_p * Cout_p)))
    Ho_p = _round_up(Ho, TH)
    nR = Ho_p // TH
    DH = (Kh - 1) // sh                  # coarse-row halo carried by each block
    M = TH * Wo_p

    # Padded geometry: row phase pi reads padded row h*sh + pi; width-unfolded
    # slot (wo, j) reads padded column wo*sw + j.  Pad so all reads are in range.
    Hc = max(Ho_p + DH, -(-(H + ph) // sh))
    Hp = Hc * sh
    Wp = max((Wo_p - 1) * sw + Kw, W + pw)

    # ----- preprocessing (pure XLA, bf16 from the start) -----
    xh = jnp.transpose(x.astype(jnp.bfloat16), (0, 2, 3, 1))          # NHWC
    xh = jnp.pad(xh, ((0, 0), (ph, Hp - H - ph), (pw, Wp - W - pw), (0, 0)))
    # height-stride phase split: (B, sh, Hc, Wp, Cin)
    xr = jnp.transpose(xh.reshape(B, Hc, sh, Wp, Cin), (0, 2, 1, 3, 4))
    # width unfold, stride folded in: xu[..., wo, j*Cin + c] = xr[..., wo*sw+j, c]
    cols = [lax.slice(xr, (0, 0, 0, j, 0),
                      (B, sh, Hc, j + (Wo_p - 1) * sw + 1, Cin),
                      (1, 1, 1, sw, 1)) for j in range(Kw)]
    xu = jnp.stack(cols, axis=4).reshape(B, sh, Hc, Wo_p, K)
    # disjoint row blocks, each carrying its own DH-row halo
    xb = jnp.stack([xu[:, :, r * TH:r * TH + TH + DH] for r in range(nR)],
                   axis=1)
    xb = xb.reshape(B * nR, sh, TH + DH, Wo_p, K)

    # (Cout, Cin, Kh, Kw) -> (Kh, Kw*Cin, Cout_p), bf16; K order matches xu.
    wt = jnp.transpose(w, (2, 3, 1, 0)).reshape(Kh, K, Cout)
    wt = jnp.pad(wt, ((0, 0), (0, 0), (0, Cout_p - Cout))).astype(jnp.bfloat16)

    sc = jnp.pad(scale.astype(jnp.float32), (0, Cout_p - Cout)).reshape(1, Cout_p)
    bs = jnp.pad(bias.astype(jnp.float32), (0, Cout_p - Cout)).reshape(1, Cout_p)

    kernel = functools.partial(_conv_bn_relu_kernel, Kh=Kh, sh=sh, TH=TH)
    out = pl.pallas_call(
        kernel,
        out_shape=jax.ShapeDtypeStruct((B, Ho_p, Wo_p, Cout_p), out_dtype),
        grid=(B, nR),
        in_specs=[
            # per-step row block (with halo) -- O(TH) VMEM, streams over rows
            pl.BlockSpec((1, sh, TH + DH, Wo_p, K),
                         lambda b, r: (b * nR + r, 0, 0, 0, 0)),
            pl.BlockSpec((Kh, K, Cout_p), lambda b, r: (0, 0, 0)),
            pl.BlockSpec((1, Cout_p), lambda b, r: (0, 0)),
            pl.BlockSpec((1, Cout_p), lambda b, r: (0, 0)),
        ],
        out_specs=pl.BlockSpec((1, TH, Wo_p, Cout_p), lambda b, r: (b, r, 0, 0)),
        scratch_shapes=[pltpu.VMEM((M, Cout_p), jnp.float32)],
        compiler_params=pltpu.CompilerParams(
            dimension_semantics=("parallel", "parallel")),
    )(xb, wt, sc, bs)

    out = out[:, :Ho, :Wo, :Cout]                 # strip alignment padding
    # TODO(synk): when the surrounding network is NHWC (and tolerates bf16),
    # keep the kernel's NHWC/bf16 output and drop this transpose; it exists
    # only to honour the PyTorch module's NCHW f32 boundary.
    return jnp.transpose(out, (0, 3, 1, 2))


def single_conv(x, params, stride, padding):
    """SingleConv: Conv2d -> BatchNorm2d (eval mode, folded) -> ReLU."""
    inv = 1.0 / jnp.sqrt(params["var"] + EPS)
    scale = params["gamma"] * inv
    bias = (params["b"] - params["mean"]) * scale + params["beta"]
    return conv_bn_relu(x, params["w"], scale, bias, stride, padding)


# ------------------------- reference & param helpers -------------------------

def single_conv_reference(x, params, stride, padding):
    sh, sw = _pair(stride)
    ph, pw = _pair(padding)
    y = lax.conv_general_dilated(
        x, params["w"], window_strides=(sh, sw),
        padding=[(ph, ph), (pw, pw)],
        dimension_numbers=("NCHW", "OIHW", "NCHW"))
    y = y + params["b"][None, :, None, None]
    inv = 1.0 / jnp.sqrt(params["var"] + EPS)
    y = (y - params["mean"][None, :, None, None]) * inv[None, :, None, None]
    y = (y * params["gamma"][None, :, None, None]
         + params["beta"][None, :, None, None])
    return jnp.maximum(y, 0.0)


def init_single_conv_params(key, cin, cout, kh, kw):
    ks = jax.random.split(key, 6)
    return dict(
        w=0.05 * jax.random.normal(ks[0], (cout, cin, kh, kw), jnp.float32),
        b=0.01 * jax.random.normal(ks[1], (cout,), jnp.float32),
        gamma=1.0 + 0.1 * jax.random.normal(ks[2], (cout,), jnp.float32),
        beta=0.1 * jax.random.normal(ks[3], (cout,), jnp.float32),
        mean=0.05 * jax.random.normal(ks[4], (cout,), jnp.float32),
        var=1.0 + 0.1 * jax.random.uniform(ks[5], (cout,), jnp.float32),
    )


# ---------------------------------- main -------------------------------------

if __name__ == "__main__":
    key = jax.random.PRNGKey(0)

    # (Cin, Cout, (Kh,Kw), stride, padding, (H,W)) -- small shapes
    configs = [
        (4, 32, (3, 3), (1, 1), (1, 1), (16, 16)),   # square kernel (docstring)
        (8, 48, (3, 3), (2, 2), (1, 1), (16, 16)),   # strided square kernel
        (3, 64, (1, 7), (1, 2), (0, 3), (8, 64)),    # wide 1-D style kernel
    ]
    B = 2

    for idx, (cin, cout, k, s, p, hw) in enumerate(configs):
        key, kx, kp = jax.random.split(key, 3)
        x = jax.random.normal(kx, (B, cin, *hw), jnp.float32)
        params = init_single_conv_params(kp, cin, cout, *k)

        fwd = jax.jit(functools.partial(single_conv, stride=s, padding=p))
        out = fwd(x, params)
        jax.block_until_ready(out)

        ref = single_conv_reference(x, params, s, p)
        ho = (hw[0] + 2 * p[0] - k[0]) // s[0] + 1
        wo = (hw[1] + 2 * p[1] - k[1]) // s[1] + 1
        assert out.shape == (B, cout, ho, wo), (idx, out.shape)
        err = float(jnp.max(jnp.abs(out - ref)))
        tol = 1e-2 + 2e-2 * float(jnp.max(jnp.abs(ref)))   # bf16 MXU, f32 accum
        assert err < tol, f"config {idx}: max abs err {err} > tol {tol}"

    print("KERNEL_OK")
</pallas_src>

<mosaic_0001>
module attributes {stable_mosaic.version = 11 : i64} {
  func.func @_conv_bn_relu_kernel(%arg0: i32, %arg1: i32, %arg2: memref<1x1x18x16x12xbf16, #tpu.memory_space<vmem>>, %arg3: memref<3x12x128xbf16, #tpu.memory_space<vmem>>, %arg4: memref<1x128xf32, #tpu.memory_space<vmem>>, %arg5: memref<1x128xf32, #tpu.memory_space<vmem>>, %arg6: memref<1x16x16x128xf32, #tpu.memory_space<vmem>>, %arg7: memref<256x128xf32, #tpu.memory_space<vmem>>) attributes {dimension_semantics = [#tpu.dimension_semantics<parallel>, #tpu.dimension_semantics<parallel>], iteration_bounds = array<i64: 2, 1>, scalar_prefetch = 0 : i64, scratch_operands = 1 : i64, tpu.core_type = #tpu.core_type<tc>, window_params = [{transform_indices = @transform_0, window_bounds = array<i64: 1, 1, 18, 16, 12>}, {pipeline_mode = #tpu.pipeline_mode<synchronous>, transform_indices = @transform_1, window_bounds = array<i64: 3, 12, 128>}, {pipeline_mode = #tpu.pipeline_mode<synchronous>, transform_indices = @transform_2, window_bounds = array<i64: 1, 128>}, {pipeline_mode = #tpu.pipeline_mode<synchronous>, transform_indices = @transform_3, window_bounds = array<i64: 1, 128>}, {transform_indices = @transform_4, window_bounds = array<i64: 1, 16, 16, 128>}]} {
    %c0 = arith.constant 0 : index
    %c0_0 = arith.constant 0 : index
    %c0_1 = arith.constant 0 : index
    %c0_2 = arith.constant 0 : index
    %c0_3 = arith.constant 0 : index
    %0 = vector.load %arg2[%c0, %c0_0, %c0_1, %c0_2, %c0_3] : memref<1x1x18x16x12xbf16, #tpu.memory_space<vmem>>, vector<1x1x16x16x12xbf16>
    %1 = vector.shape_cast %0 : vector<1x1x16x16x12xbf16> to vector<16x16x12xbf16>
    %2 = vector.shape_cast %1 : vector<16x16x12xbf16> to vector<256x12xbf16>
    %c0_4 = arith.constant 0 : index
    %c0_5 = arith.constant 0 : index
    %c0_6 = arith.constant 0 : index
    %3 = vector.load %arg3[%c0_4, %c0_5, %c0_6] : memref<3x12x128xbf16, #tpu.memory_space<vmem>>, vector<1x12x128xbf16>
    %4 = vector.shape_cast %3 : vector<1x12x128xbf16> to vector<12x128xbf16>
    %cst = arith.constant dense<0.000000e+00> : vector<256x128xf32>
    %5 = tpu.matmul %2, %4, %cst {dimension_numbers = #tpu.dot_dimension_numbers<[1], [0], [0], [1], [0, 0, 1, 1], [], []>} : vector<256x12xbf16>, vector<12x128xbf16>, vector<256x128xf32> -> vector<256x128xf32>
    %c0_7 = arith.constant 0 : index
    %c0_8 = arith.constant 0 : index
    %6 = vector.load %arg7[%c0_7, %c0_8] : memref<256x128xf32, #tpu.memory_space<vmem>>, vector<256x128xf32>
    tpu.vector_store %arg7[%c0_7, %c0_8], %5 {strides = array<i32>} : memref<256x128xf32, #tpu.memory_space<vmem>>, vector<256x128xf32>,
    %c0_9 = arith.constant 0 : index
    %c0_10 = arith.constant 0 : index
    %c1 = arith.constant 1 : index
    %c0_11 = arith.constant 0 : index
    %c0_12 = arith.constant 0 : index
    %7 = vector.load %arg2[%c0_9, %c0_10, %c1, %c0_11, %c0_12] : memref<1x1x18x16x12xbf16, #tpu.memory_space<vmem>>, vector<1x1x16x16x12xbf16>
    %8 = vector.shape_cast %7 : vector<1x1x16x16x12xbf16> to vector<16x16x12xbf16>
    %9 = vector.shape_cast %8 : vector<16x16x12xbf16> to vector<256x12xbf16>
    %c1_13 = arith.constant 1 : index
    %c0_14 = arith.constant 0 : index
    %c0_15 = arith.constant 0 : index
    %10 = vector.load %arg3[%c1_13, %c0_14, %c0_15] : memref<3x12x128xbf16, #tpu.memory_space<vmem>>, vector<1x12x128xbf16>
    %11 = vector.shape_cast %10 : vector<1x12x128xbf16> to vector<12x128xbf16>
    %cst_16 = arith.constant dense<0.000000e+00> : vector<256x128xf32>
    %12 = tpu.matmul %9, %11, %cst_16 {dimension_numbers = #tpu.dot_dimension_numbers<[1], [0], [0], [1], [0, 0, 1, 1], [], []>} : vector<256x12xbf16>, vector<12x128xbf16>, vector<256x128xf32> -> vector<256x128xf32>
    %c0_17 = arith.constant 0 : index
    %c0_18 = arith.constant 0 : index
    %13 = vector.load %arg7[%c0_17, %c0_18] : memref<256x128xf32, #tpu.memory_space<vmem>>, vector<256x128xf32>
    %14 = arith.addf %13, %12 : vector<256x128xf32>
    %c0_19 = arith.constant 0 : index
    %c0_20 = arith.constant 0 : index
    %15 = vector.load %arg7[%c0_19, %c0_20] : memref<256x128xf32, #tpu.memory_space<vmem>>, vector<256x128xf32>
    tpu.vector_store %arg7[%c0_19, %c0_20], %14 {strides = array<i32>} : memref<256x128xf32, #tpu.memory_space<vmem>>, vector<256x128xf32>,
    %c0_21 = arith.constant 0 : index
    %c0_22 = arith.constant 0 : index
    %c2 = arith.constant 2 : index
    %c0_23 = arith.constant 0 : index
    %c0_24 = arith.constant 0 : index
    %16 = vector.load %arg2[%c0_21, %c0_22, %c2, %c0_23, %c0_24] : memref<1x1x18x16x12xbf16, #tpu.memory_space<vmem>>, vector<1x1x16x16x12xbf16>
    %17 = vector.shape_cast %16 : vector<1x1x16x16x12xbf16> to vector<16x16x12xbf16>
    %18 = vector.shape_cast %17 : vector<16x16x12xbf16> to vector<256x12xbf16>
    %c2_25 = arith.constant 2 : index
    %c0_26 = arith.constant 0 : index
    %c0_27 = arith.constant 0 : index
    %19 = vector.load %arg3[%c2_25, %c0_26, %c0_27] : memref<3x12x128xbf16, #tpu.memory_space<vmem>>, vector<1x12x128xbf16>
    %20 = vector.shape_cast %19 : vector<1x12x128xbf16> to vector<12x128xbf16>
    %cst_28 = arith.constant dense<0.000000e+00> : vector<256x128xf32>
    %21 = tpu.matmul %18, %20, %cst_28 {dimension_numbers = #tpu.dot_dimension_numbers<[1], [0], [0], [1], [0, 0, 1, 1], [], []>} : vector<256x12xbf16>, vector<12x128xbf16>, vector<256x128xf32> -> vector<256x128xf32>
    %c0_29 = arith.constant 0 : index
    %c0_30 = arith.constant 0 : index
    %22 = vector.load %arg7[%c0_29, %c0_30] : memref<256x128xf32, #tpu.memory_space<vmem>>, vector<256x128xf32>
    %23 = arith.addf %22, %21 : vector<256x128xf32>
    %c0_31 = arith.constant 0 : index
    %c0_32 = arith.constant 0 : index
    %24 = vector.load %arg7[%c0_31, %c0_32] : memref<256x128xf32, #tpu.memory_space<vmem>>, vector<256x128xf32>
    tpu.vector_store %arg7[%c0_31, %c0_32], %23 {strides = array<i32>} : memref<256x128xf32, #tpu.memory_space<vmem>>, vector<256x128xf32>,
    %c0_33 = arith.constant 0 : index
    %c0_34 = arith.constant 0 : index
    %25 = vector.load %arg7[%c0_33, %c0_34] : memref<256x128xf32, #tpu.memory_space<vmem>>, vector<256x128xf32>
    %c0_35 = arith.constant 0 : index
    %c0_36 = arith.constant 0 : index
    %26 = vector.load %arg4[%c0_35, %c0_36] : memref<1x128xf32, #tpu.memory_space<vmem>>, vector<1x128xf32>
    %27 = vector.broadcast %26 : vector<1x128xf32> to vector<256x128xf32>
    %28 = arith.mulf %25, %27 : vector<256x128xf32>
    %c0_37 = arith.constant 0 : index
    %c0_38 = arith.constant 0 : index
    %29 = vector.load %arg5[%c0_37, %c0_38] : memref<1x128xf32, #tpu.memory_space<vmem>>, vector<1x128xf32>
    %30 = vector.broadcast %29 : vector<1x128xf32> to vector<256x128xf32>
    %31 = arith.addf %28, %30 : vector<256x128xf32>
    %cst_39 = arith.constant 0.000000e+00 : f32
    %32 = vector.broadcast %cst_39 : f32 to vector<256x128xf32>
    %33 = arith.maximumf %31, %32 : vector<256x128xf32>
    %34 = vector.shape_cast %33 : vector<256x128xf32> to vector<16x16x128xf32>
    %c0_40 = arith.constant 0 : index
    %c0_41 = arith.constant 0 : index
    %c0_42 = arith.constant 0 : index
    %c0_43 = arith.constant 0 : index
    %35 = vector.load %arg6[%c0_40, %c0_41, %c0_42, %c0_43] : memref<1x16x16x128xf32, #tpu.memory_space<vmem>>, vector<1x16x16x128xf32>
    %36 = vector.shape_cast %35 : vector<1x16x16x128xf32> to vector<16x16x128xf32>
    %37 = vector.shape_cast %34 : vector<16x16x128xf32> to vector<1x16x16x128xf32>
    tpu.vector_store %arg6[%c0_40, %c0_41, %c0_42, %c0_43], %37 {strides = array<i32>} : memref<1x16x16x128xf32, #tpu.memory_space<vmem>>, vector<1x16x16x128xf32>,
    return
  }
  func.func @transform_0(%arg0: i32, %arg1: i32) -> (i32, i32, i32, i32, i32) {
    %c1_i32 = arith.constant 1 : i32
    %0 = arith.muli %arg0, %c1_i32 : i32
    %1 = arith.addi %0, %arg1 : i32
    %c0_i32 = arith.constant 0 : i32
    %c0_i32_0 = arith.constant 0 : i32
    %c0_i32_1 = arith.constant 0 : i32
    %c0_i32_2 = arith.constant 0 : i32
    %c0_i32_3 = arith.constant 0 : i32
    return %1, %c0_i32, %c0_i32_0, %c0_i32_1, %c0_i32_2 : i32, i32, i32, i32, i32
  }
  func.func @transform_1(%arg0: i32, %arg1: i32) -> (i32, i32, i32) {
    %c0_i32 = arith.constant 0 : i32
    %c0_i32_0 = arith.constant 0 : i32
    %c0_i32_1 = arith.constant 0 : i32
    %c0_i32_2 = arith.constant 0 : i32
    return %c0_i32, %c0_i32_0, %c0_i32_1 : i32, i32, i32
  }
  func.func @transform_2(%arg0: i32, %arg1: i32) -> (i32, i32) {
    %c0_i32 = arith.constant 0 : i32
    %c0_i32_0 = arith.constant 0 : i32
    %c0_i32_1 = arith.constant 0 : i32
    return %c0_i32, %c0_i32_0 : i32, i32
  }
  func.func @transform_3(%arg0: i32, %arg1: i32) -> (i32, i32) {
    %c0_i32 = arith.constant 0 : i32
    %c0_i32_0 = arith.constant 0 : i32
    %c0_i32_1 = arith.constant 0 : i32
    return %c0_i32, %c0_i32_0 : i32, i32
  }
  func.func @transform_4(%arg0: i32, %arg1: i32) -> (i32, i32, i32, i32) {
    %c0_i32 = arith.constant 0 : i32
    %c0_i32_0 = arith.constant 0 : i32
    %c0_i32_1 = arith.constant 0 : i32
    return %arg0, %arg1, %c0_i32, %c0_i32_0 : i32, i32, i32, i32
  }
}

</mosaic_0001>

<bundles_post_ra>
// kernel: single_conv.1
= control target key start
LH: loop header
LB: loop body
LE: loop exit
PB: predicated region body
PF: predicated region fallthrough
CT: control target
= control target key end

     0   :  { %s2243_s15 = smov 0   ;;  %s2245_s16 = smov 0   ;;  %s2520_s0 = inlined_call_operand.vmem [shape: bf16[2,1,18,16,12], index: 0, kind: input, shape index: {}]   ;;  %s2521_s1 = inlined_call_operand.vmem [shape: bf16[3,12,128], index: 1, kind: input, shape index: {}]   ;;  %s2522_s2 = inlined_call_operand.vmem [shape: f32[1,128], index: 2, kind: input, shape index: {}]   ;;  %s2523_s3 = inlined_call_operand.vmem [shape: f32[1,128], index: 3, kind: input, shape index: {}]   ;;  %s2524_s4 = inlined_call_operand.vmem [shape: f32[2,16,16,128], index: 4, kind: output, shape index: {}]  }
   0x1   :  { %s2247_s17 = smov 0  }
   0x2 LB: > { %s26_s18 = sadd.s32 1, %s2212_s16  ;;  %p1719_p0 = scmp.ge.s32.totalorder %s2216_s17, 1  ;;  %s2216_s17 = sphi %s2247_s17, %s14_s17   ;;  %s2212_s16 = sphi %s2245_s16, %s2526_s16   ;;  %s2208_s15 = sphi %s2243_s15, %s2525_s15  }
   0x3   : > { %p28_p1 = scmp.ge.s32.totalorder %s26_s18, 2  ;;  %p180_p2 = scmp.lt.s32.totalorder %s2216_s17, 3 }
   0x5   : > { %s2528_s18 = smov (%p28_p1, %s26_s18), 0  ;;  %p181_p3 = pnand %p1719_p0, %p180_p2 }
   0x6   : > { %v2143_v0 = vld [vmem:[%s2521_s1] sm:$0x3f] (!%p181_p3)   ;;  %vm399_vm0 = vcmask (!%p181_p3), 1045504   ;;  %p213_p4 = scmp.lt.s32.totalorder (!%p181_p3), %s2208_s15, 1  ;;  %v2144_v1 = vld [vmem:[%s2521_s1 + $0x8] sm:$0x3f] (!%p181_p3)  }
   0x7   : > { %184 = sbr.rel (%p181_p3) target bundleno = 332 (0x14c), region = 36  ;;  %2114 = vmatprep.subr.msk.bf16.mxu1 (!%p181_p3), %vm399_vm0, %v2143_v0  ;;  %v401_v2 = vsel (!%p181_p3), %vm399_vm0, %v2143_v0, 0  ;;  %v2147_v3 = vld [vmem:[%s2521_s1 + $0x10] sm:$0x3f] (!%p181_p3)   ;;  %2115 = vmatprep.subr.msk.bf16.mxu0 (!%p181_p3), %vm399_vm0, %v2144_v1  ;;  %v766_v4 = vsel (!%p181_p3), %vm399_vm0, %v2144_v1, 0  ;;  %vm350_vm1 = vcmask (!%p181_p3), 97280  }
   0x8   : > { %1947 = vmatpush3.bf16.msra.mxu1 (!%p181_p3), %v401_v2  ;;  %1981 = vmatpush3.bf16.msra.mxu0 (!%p181_p3), %v766_v4  ;;  %v1195_v9 = vsel (!%p181_p3), %vm399_vm0, %v2147_v3, 0 }
   0x9   : > { %2116 = vmatprep.subr.msk.bf16.mxu1 (!%p181_p3), %vm399_vm0, %v2144_v1  ;;  %2117 = vmatprep.subr.msk.bf16.mxu0 (!%p181_p3), %vm399_vm0, %v2147_v3 }
   0xe   : > { %s2530_s15 = smov (!%p213_p4, %s2208_s15), 1 }
   0xf   : > { %s2118_s25 = smul.u32 144, %s2530_s15  ;;  %s1894_s7 = sshll.u32 %s2530_s15, 8 }
  0x10   : > { %s2411_s10 = scalar_lea.vmem %s2524_s4, %s1894_s7 }
  0x11   : > { %s2282_s28 = scalar_lea.vmem %s2520_s0, %s2118_s25 }
  0x12   : > { %v2145_v5 = vld [vmem:[%s2282_s28] sm:$0xff]   ;;  %v2146_v6 = vld [vmem:[%s2282_s28 + $0x8] sm:$0xff]   ;;  %v2149_v8 = vld [vmem:[%s2282_s28 + $0x10] sm:$0xff]  }
  0x13   : > { %1948 = vmatprep.mubr.msk.bf16.mxu1 %vm350_vm1, %v2145_v5  ;;  %v2148_v7 = vld [vmem:[%s2282_s28 + $0x8] sm:$0xff]   ;;  %1982 = vmatprep.mubr.msk.bf16.mxu0 %vm350_vm1, %v2146_v6  ;;  %v2150_v10 = vld [vmem:[%s2282_s28 + $0x10] sm:$0xff]   ;;  %v2151_v11 = vld [vmem:[%s2282_s28 + $0x18] sm:$0xff]  }
  0x14   : > { %1949 = vmatmul.mubr.msk.bf16.vlgmr.msra.gmra.mrb[0].mxu1 %vm350_vm1, %v2148_v7  ;;  %1983 = vmatmul.mubr.msk.bf16.vlgmr.msra.gmra.mrb[0].mxu0 %vm350_vm1, %v2149_v8  ;;  %v2152_v12 = vld [vmem:[%s2282_s28 + $0x18] sm:$0xff]   ;;  %v2153_v13 = vld [vmem:[%s2282_s28 + $0x20] sm:$0xff]   ;;  %v2155_v15 = vld [vmem:[%s2282_s28 + $0x28] sm:$0xff]  }
  0x15   : > { %2049 = vmatpush3.bf16.msra.mxu1 %v766_v4  ;;  %2015 = vmatpush3.bf16.msra.mxu0 %v1195_v9  ;;  %v2154_v14 = vld [vmem:[%s2282_s28 + $0x20] sm:$0xff]   ;;  %v2156_v16 = vld [vmem:[%s2282_s28 + $0x28] sm:$0xff]   ;;  %v2157_v17 = vld [vmem:[%s2282_s28 + $0x30] sm:$0xff]  }
  0x16   : > { %1952 = vmatprep.mubr.msk.bf16.mxu1 %vm350_vm1, %v2150_v10  ;;  %1986 = vmatprep.mubr.msk.bf16.mxu0 %vm350_vm1, %v2151_v11  ;;  %v2158_v18 = vld [vmem:[%s2282_s28 + $0x30] sm:$0xff]   ;;  %v2159_v19 = vld [vmem:[%s2282_s28 + $0x38] sm:$0xff]   ;;  %v2161_v21 = vld [vmem:[%s2282_s28 + $0x40] sm:$0xff]  }
  0x17   : > { %v2160_v20 = vld [vmem:[%s2282_s28 + $0x38] sm:$0xff]   ;;  %v2162_v22 = vld [vmem:[%s2282_s28 + $0x40] sm:$0xff]   ;;  %v2163_v23 = vld [vmem:[%s2282_s28 + $0x10] sm:$0xff]  }
  0x18   : > { %v2164_v24 = vld [vmem:[%s2282_s28 + $0x48] sm:$0xff]   ;;  %v2165_v25 = vld [vmem:[%s2282_s28 + $0x18] sm:$0xff]   ;;  %v2166_v26 = vld [vmem:[%s2282_s28 + $0x50] sm:$0xff]  }
  0x19   : > { %v2167_v27 = vld [vmem:[%s2282_s28 + $0x20] sm:$0xff]   ;;  %v2168_v28 = vld [vmem:[%s2282_s28 + $0x58] sm:$0xff]   ;;  %v2169_v29 = vld [vmem:[%s2282_s28 + $0x28] sm:$0xff]  }
  0x1a   : > { %v2170_v30 = vld [vmem:[%s2282_s28 + $0x60] sm:$0xff]   ;;  %v2171_v31 = vld [vmem:[%s2282_s28 + $0x30] sm:$0xff]   ;;  %v2172_v32 = vld [vmem:[%s2282_s28 + $0x68] sm:$0xff]  }
  0x1b   : > { %v2173_v33 = vld [vmem:[%s2282_s28 + $0x38] sm:$0xff]   ;;  %v2174_v34 = vld [vmem:[%s2282_s28 + $0x70] sm:$0xff]   ;;  %v2175_v35 = vld [vmem:[%s2282_s28 + $0x40] sm:$0xff]  }
  0x1c   : > { %1953 = vmatmul.mubr.msk.bf16.gmra.mrb[4].mxu1 %vm350_vm1, %v2152_v12  ;;  %1987 = vmatmul.mubr.msk.bf16.gmra.mrb[4].mxu0 %vm350_vm1, %v2153_v13  ;;  %v2176_v36 = vld [vmem:[%s2282_s28 + $0x78] sm:$0xff]   ;;  %v2177_v37 = vld [vmem:[%s2282_s28 + $0x48] sm:$0xff]   ;;  %v2179_v39 = vld [vmem:[%s2282_s28 + $0x50] sm:$0xff]  }
  0x1d   : > { %1956 = vmatprep.mubr.msk.bf16.mxu1 %vm350_vm1, %v2154_v14  ;;  %1990 = vmatprep.mubr.msk.bf16.mxu0 %vm350_vm1, %v2155_v15  ;;  %v2178_v38 = vld [vmem:[%s2282_s28 + $0x48] sm:$0xff]   ;;  %v2180_v40 = vld [vmem:[%s2282_s28 + $0x50] sm:$0xff]   ;;  %v2181_v41 = vld [vmem:[%s2282_s28 + $0x58] sm:$0xff]  }
  0x1e   : > { %v2182_v42 = vld [vmem:[%s2282_s28 + $0x58] sm:$0xff]   ;;  %v2183_v43 = vld [vmem:[%s2282_s28 + $0x60] sm:$0xff]   ;;  %v2185_v45 = vld [vmem:[%s2282_s28 + $0x68] sm:$0xff]  }
  0x1f   : > { %v2184_v44 = vld [vmem:[%s2282_s28 + $0x60] sm:$0xff]   ;;  %v2186_v46 = vld [vmem:[%s2282_s28 + $0x68] sm:$0xff]   ;;  %v2187_v47 = vld [vmem:[%s2282_s28 + $0x70] sm:$0xff]  }
  0x20   : > { %v2188_v48 = vld [vmem:[%s2282_s28 + $0x70] sm:$0xff]   ;;  %v2189_v49 = vld [vmem:[%s2282_s28 + $0x78] sm:$0xff]   ;;  %v2191_v51 = vld [vmem:[%s2282_s28 + $0x80] sm:$0xff]  }
  0x21   : > { %v2190_v50 = vld [vmem:[%s2282_s28 + $0x78] sm:$0xff]   ;;  %v2192_v52 = vld [vmem:[%s2282_s28 + $0x80] sm:$0xff]   ;;  %v2193_v53 = vld [vmem:[%s2282_s28 + $0x88] sm:$0xff]  }
  0x22   : > { %v2396_v7 = vld [vmem:[%s2522_s2] ss:$0 sm:$0xff] }
  0x23   : > { %v2401_v10 = vld [vmem:[%s2523_s3] ss:$0 sm:$0xff] }
  0x24   : > { %1957 = vmatmul.mubr.msk.bf16.gmra.mrb[8].mxu1 %vm350_vm1, %v2156_v16  ;;  %1991 = vmatmul.mubr.msk.bf16.gmra.mrb[8].mxu0 %vm350_vm1, %v2157_v17 }
  0x25   : > { %1960 = vmatprep.mubr.msk.bf16.mxu1 %vm350_vm1, %v2158_v18  ;;  %1994 = vmatprep.mubr.msk.bf16.mxu0 %vm350_vm1, %v2159_v19 }
  0x2c   : > { %1961 = vmatmul.mubr.msk.bf16.gmra.mrb[12].mxu1 %vm350_vm1, %v2160_v20  ;;  %1995 = vmatmul.mubr.msk.bf16.gmra.mrb[12].mxu0 %vm350_vm1, %v2161_v21 }
  0x2d   : > { %1964 = vmatprep.mubr.msk.bf16.mxu1 %vm350_vm1, %v2162_v22  ;;  %2016 = vmatprep.mubr.msk.bf16.mxu0 %vm350_vm1, %v2163_v23 }
  0x34   : > { %1965 = vmatmul.mubr.msk.bf16.gmra.mrb[16].mxu1 %vm350_vm1, %v2164_v24  ;;  %2017 = vmatmul.mubr.msk.bf16.vlgmr.msra.gmra.mrb[0].mxu0 %vm350_vm1, %v2165_v25 }
  0x35   : > { %1968 = vmatprep.mubr.msk.bf16.mxu1 %vm350_vm1, %v2166_v26  ;;  %2020 = vmatprep.mubr.msk.bf16.mxu0 %vm350_vm1, %v2167_v27 }
  0x3c   : > { %1969 = vmatmul.mubr.msk.bf16.gmra.mrb[20].mxu1 %vm350_vm1, %v2168_v28  ;;  %2021 = vmatmul.mubr.msk.bf16.gmra.mrb[4].mxu0 %vm350_vm1, %v2169_v29 }
  0x3d   : > { %1972 = vmatprep.mubr.msk.bf16.mxu1 %vm350_vm1, %v2170_v30  ;;  %2024 = vmatprep.mubr.msk.bf16.mxu0 %vm350_vm1, %v2171_v31 }
  0x44   : > { %1973 = vmatmul.mubr.msk.bf16.gmra.mrb[24].mxu1 %vm350_vm1, %v2172_v32  ;;  %2025 = vmatmul.mubr.msk.bf16.gmra.mrb[8].mxu0 %vm350_vm1, %v2173_v33 }
  0x45   : > { %1976 = vmatprep.mubr.msk.bf16.mxu1 %vm350_vm1, %v2174_v34  ;;  %2028 = vmatprep.mubr.msk.bf16.mxu0 %vm350_vm1, %v2175_v35 }
  0x4c   : > { %1977 = vmatmul.mubr.msk.bf16.gmra.mrb[28].mxu1 %vm350_vm1, %v2176_v36  ;;  %2029 = vmatmul.mubr.msk.bf16.gmra.mrb[12].mxu0 %vm350_vm1, %v2177_v37 }
  0x4d   : > { %1998 = vmatprep.mubr.msk.bf16.mxu1 %vm350_vm1, %v2178_v38  ;;  %2032 = vmatprep.mubr.msk.bf16.mxu0 %vm350_vm1, %v2179_v39 }
  0x54   : > { %1999 = vmatmul.mubr.msk.bf16.vlgmr.msra.gmra.mrb[16].mxu1 %vm350_vm1, %v2180_v40  ;;  %2033 = vmatmul.mubr.msk.bf16.gmra.mrb[16].mxu0 %vm350_vm1, %v2181_v41 }
  0x55   : > { %2002 = vmatprep.mubr.msk.bf16.mxu1 %vm350_vm1, %v2182_v42  ;;  %2036 = vmatprep.mubr.msk.bf16.mxu0 %vm350_vm1, %v2183_v43 }
  0x5c   : > { %2003 = vmatmul.mubr.msk.bf16.gmra.mrb[20].mxu1 %vm350_vm1, %v2184_v44  ;;  %2037 = vmatmul.mubr.msk.bf16.gmra.mrb[20].mxu0 %vm350_vm1, %v2185_v45 }
  0x5d   : > { %2006 = vmatprep.mubr.msk.bf16.mxu1 %vm350_vm1, %v2186_v46  ;;  %2040 = vmatprep.mubr.msk.bf16.mxu0 %vm350_vm1, %v2187_v47 }
  0x64   : > { %2007 = vmatmul.mubr.msk.bf16.gmra.mrb[24].mxu1 %vm350_vm1, %v2188_v48  ;;  %2041 = vmatmul.mubr.msk.bf16.gmra.mrb[24].mxu0 %vm350_vm1, %v2189_v49 }
  0x65   : > { %2010 = vmatprep.mubr.msk.bf16.mxu1 %vm350_vm1, %v2190_v50  ;;  %2044 = vmatprep.mubr.msk.bf16.mxu0 %vm350_vm1, %v2191_v51 }
  0x6c   : > { %2011 = vmatmul.mubr.msk.bf16.gmra.mrb[28].mxu1 %vm350_vm1, %v2192_v52  ;;  %2045 = vmatmul.mubr.msk.bf16.gmra.mrb[28].mxu0 %vm350_vm1, %v2193_v53 }
  0xe7   : > { %v1950_v54 = vpop.f32.mrb[0].mxu1 }
  0xe8   : > { %v437_v55 = vpop.f32.mrb[1].mxu1 }
  0xe9   : > { %v1951_v56 = vpop.f32.mrb[2].mxu1 }
  0xea   : > { %v440_v57 = vpop.f32.mrb[3].mxu1 }
  0xef   : > { %v1954_v58 = vpop.f32.mrb[4].mxu1 }
  0xf0   : > { %v453_v59 = vpop.f32.mrb[5].mxu1 }
  0xf1   : > { %v1955_v60 = vpop.f32.mrb[6].mxu1 }
  0xf2   : > { %v456_v61 = vpop.f32.mrb[7].mxu1 }
  0xf7   : > { %v1958_v62 = vpop.f32.mrb[8].mxu1 }
  0xf8   : > { %v469_v63 = vpop.f32.mrb[9].mxu1 }
  0xf9   : > { %v2381_v0 = vpop.f32.mrb[10].mxu1 }
  0xfa   : > { %v2383_v1 = vpop.f32.mrb[11].mxu1 }
  0xff   : > { %v2385_v2 = vpop.f32.mrb[12].mxu1 }
 0x100   : > { %v2387_v3 = vpop.f32.mrb[13].mxu1 }
 0x101   : > { %v2389_v4 = vpop.f32.mrb[14].mxu1 }
 0x102   : > { %v2391_v5 = vpop.f32.mrb[15].mxu1 }
 0x107   : > { %v2018_v6 = vpop.f32.mrb[0].mxu0 }
 0x108   : > { %v2050_v8 = vadd.f32 %v2018_v6, %v1950_v54  ;;  %v1231_v9 = vpop.f32.mrb[1].mxu0 }
 0x109   : > { %v2051_v11 = vadd.f32 %v1231_v9, %v437_v55  ;;  %v2019_v12 = vpop.f32.mrb[2].mxu0 }
 0x10a   : > { %v1495_v13 = vmul.f32 %v2050_v8, %v2396_v7  ;;  %v2052_v14 = vadd.f32 %v2019_v12, %v1951_v56  ;;  %v1234_v15 = vpop.f32.mrb[3].mxu0 }
 0x10b   : > { %v1493_v16 = vmul.f32 %v2051_v11, %v2396_v7  ;;  %v2053_v17 = vadd.f32 %v1234_v15, %v440_v57 }
 0x10c   : > { %v1534_v18 = vadd.f32 %v2401_v10, %v1495_v13  ;;  %v1496_v19 = vmul.f32 %v2052_v14, %v2396_v7 }
 0x10d   : > { %v1532_v20 = vadd.f32 %v2401_v10, %v1493_v16  ;;  %v1494_v21 = vmul.f32 %v2053_v17, %v2396_v7 }
 0x10e   : > { %v1566_v22 = vmax.f32 %v1534_v18, 0.0  ;;  %v1535_v23 = vadd.f32 %v2401_v10, %v1496_v19 }
 0x10f   : > { %v1564_v24 = vmax.f32 %v1532_v20, 0.0  ;;  %v1533_v25 = vadd.f32 %v2401_v10, %v1494_v21  ;;  %v2022_v26 = vpop.f32.mrb[4].mxu0 }
 0x110   : > { %1598 = vst [vmem:[%s2411_s10 + $0x10] sm:$0xff] %v1566_v22  ;;  %v1567_v27 = vmax.f32 %v1535_v23, 0.0  ;;  %v2054_v28 = vadd.f32 %v2022_v26, %v1954_v58  ;;  %v1247_v29 = vpop.f32.mrb[5].mxu0 }
 0x111   : > { %1596 = vst [vmem:[%s2411_s10] sm:$0xff] %v1564_v24  ;;  %v1565_v30 = vmax.f32 %v1533_v25, 0.0  ;;  %v2055_v31 = vadd.f32 %v1247_v29, %v453_v59  ;;  %v2023_v32 = vpop.f32.mrb[6].mxu0 }
 0x112   : > { %1599 = vst [vmem:[%s2411_s10 + $0x18] sm:$0xff] %v1567_v27  ;;  %v1499_v33 = vmul.f32 %v2054_v28, %v2396_v7  ;;  %v2056_v34 = vadd.f32 %v2023_v32, %v1955_v60  ;;  %v1250_v35 = vpop.f32.mrb[7].mxu0 }
 0x113   : > { %1597 = vst [vmem:[%s2411_s10 + $0x8] sm:$0xff] %v1565_v30  ;;  %v1497_v36 = vmul.f32 %v2055_v31, %v2396_v7  ;;  %v2057_v37 = vadd.f32 %v1250_v35, %v456_v61 }
 0x114   : > { %v1538_v38 = vadd.f32 %v2401_v10, %v1499_v33  ;;  %v1500_v39 = vmul.f32 %v2056_v34, %v2396_v7 }
 0x115   : > { %v1536_v40 = vadd.f32 %v2401_v10, %v1497_v36  ;;  %v1498_v41 = vmul.f32 %v2057_v37, %v2396_v7 }
 0x116   : > { %v1570_v42 = vmax.f32 %v1538_v38, 0.0  ;;  %v1539_v43 = vadd.f32 %v2401_v10, %v1500_v39 }
 0x117   : > { %v1568_v44 = vmax.f32 %v1536_v40, 0.0  ;;  %v1537_v45 = vadd.f32 %v2401_v10, %v1498_v41  ;;  %v2026_v46 = vpop.f32.mrb[8].mxu0 }
 0x118   : > { %1602 = vst [vmem:[%s2411_s10 + $0x30] sm:$0xff] %v1570_v42  ;;  %v1571_v47 = vmax.f32 %v1539_v43, 0.0  ;;  %v2058_v48 = vadd.f32 %v2026_v46, %v1958_v62  ;;  %v1263_v49 = vpop.f32.mrb[9].mxu0 }
 0x119   : > { %1600 = vst [vmem:[%s2411_s10 + $0x20] sm:$0xff] %v1568_v44  ;;  %v1569_v50 = vmax.f32 %v1537_v45, 0.0  ;;  %v2059_v51 = vadd.f32 %v1263_v49, %v469_v63  ;;  %v2027_v52 = vpop.f32.mrb[10].mxu0 }
 0x11a   : > { %1603 = vst [vmem:[%s2411_s10 + $0x38] sm:$0xff] %v1571_v47  ;;  %v1503_v53 = vmul.f32 %v2058_v48, %v2396_v7  ;;  %v2060_v54 = vadd.f32 %v2027_v52, %v2381_v0  ;;  %v1266_v55 = vpop.f32.mrb[11].mxu0 }
 0x11b   : > { %1601 = vst [vmem:[%s2411_s10 + $0x28] sm:$0xff] %v1569_v50  ;;  %v1501_v56 = vmul.f32 %v2059_v51, %v2396_v7  ;;  %v2061_v57 = vadd.f32 %v1266_v55, %v2383_v1 }
 0x11c   : > { %v1542_v58 = vadd.f32 %v2401_v10, %v1503_v53  ;;  %v1504_v59 = vmul.f32 %v2060_v54, %v2396_v7 }
 0x11d   : > { %v1540_v60 = vadd.f32 %v2401_v10, %v1501_v56  ;;  %v1502_v61 = vmul.f32 %v2061_v57, %v2396_v7 }
 0x11e   : > { %v1574_v62 = vmax.f32 %v1542_v58, 0.0  ;;  %v1543_v63 = vadd.f32 %v2401_v10, %v1504_v59 }
 0x11f   : > { %v1572_v0 = vmax.f32 %v1540_v60, 0.0  ;;  %v1541_v6 = vadd.f32 %v2401_v10, %v1502_v61  ;;  %v2030_v8 = vpop.f32.mrb[12].mxu0 }
 0x120   : > { %1606 = vst [vmem:[%s2411_s10 + $0x50] sm:$0xff] %v1574_v62  ;;  %v1575_v9 = vmax.f32 %v1543_v63, 0.0  ;;  %v2062_v1 = vadd.f32 %v2030_v8, %v2385_v2  ;;  %v1279_v11 = vpop.f32.mrb[13].mxu0 }
 0x121   : > { %1604 = vst [vmem:[%s2411_s10 + $0x40] sm:$0xff] %v1572_v0  ;;  %v1573_v12 = vmax.f32 %v1541_v6, 0.0  ;;  %v2063_v13 = vadd.f32 %v1279_v11, %v2387_v3  ;;  %v2031_v14 = vpop.f32.mrb[14].mxu0 }
 0x122   : > { %1607 = vst [vmem:[%s2411_s10 + $0x58] sm:$0xff] %v1575_v9  ;;  %v1507_v15 = vmul.f32 %v2062_v1, %v2396_v7  ;;  %v2064_v16 = vadd.f32 %v2031_v14, %v2389_v4  ;;  %v1282_v17 = vpop.f32.mrb[15].mxu0 }
 0x123   : > { %1605 = vst [vmem:[%s2411_s10 + $0x48] sm:$0xff] %v1573_v12  ;;  %v1505_v18 = vmul.f32 %v2063_v13, %v2396_v7  ;;  %v2065_v19 = vadd.f32 %v1282_v17, %v2391_v5 }
 0x124   : > { %v1546_v2 = vadd.f32 %v2401_v10, %v1507_v15  ;;  %v1508_v20 = vmul.f32 %v2064_v16, %v2396_v7 }
 0x125   : > { %v1544_v3 = vadd.f32 %v2401_v10, %v1505_v18  ;;  %v1506_v21 = vmul.f32 %v2065_v19, %v2396_v7 }
 0x126   : > { %v1578_v22 = vmax.f32 %v1546_v2, 0.0  ;;  %v1547_v23 = vadd.f32 %v2401_v10, %v1508_v20 }
 0x127   : > { %v2000_v4 = vpop.f32.mrb[16].mxu1  ;;  %v1576_v24 = vmax.f32 %v1544_v3, 0.0  ;;  %v1545_v25 = vadd.f32 %v2401_v10, %v1506_v21  ;;  %v2034_v26 = vpop.f32.mrb[16].mxu0 }
 0x128   : > { %v866_v5 = vpop.f32.mrb[17].mxu1  ;;  %1610 = vst [vmem:[%s2411_s10 + $0x70] sm:$0xff] %v1578_v22  ;;  %v1579_v27 = vmax.f32 %v1547_v23, 0.0  ;;  %v2066_v28 = vadd.f32 %v2034_v26, %v2000_v4  ;;  %v1295_v29 = vpop.f32.mrb[17].mxu0 }
 0x129   : > { %v2001_v30 = vpop.f32.mrb[18].mxu1  ;;  %1608 = vst [vmem:[%s2411_s10 + $0x60] sm:$0xff] %v1576_v24  ;;  %v1577_v31 = vmax.f32 %v1545_v25, 0.0  ;;  %v2067_v32 = vadd.f32 %v1295_v29, %v866_v5  ;;  %v2035_v33 = vpop.f32.mrb[18].mxu0 }
 0x12a   : > { %v869_v34 = vpop.f32.mrb[19].mxu1  ;;  %1611 = vst [vmem:[%s2411_s10 + $0x78] sm:$0xff] %v1579_v27  ;;  %v1511_v35 = vmul.f32 %v2066_v28, %v2396_v7  ;;  %v2068_v36 = vadd.f32 %v2035_v33, %v2001_v30  ;;  %v1298_v37 = vpop.f32.mrb[19].mxu0 }
 0x12b   : > { %1609 = vst [vmem:[%s2411_s10 + $0x68] sm:$0xff] %v1577_v31  ;;  %v1509_v38 = vmul.f32 %v2067_v32, %v2396_v7  ;;  %v2069_v39 = vadd.f32 %v1298_v37, %v869_v34 }
 0x12c   : > { %v1550_v40 = vadd.f32 %v2401_v10, %v1511_v35  ;;  %v1512_v41 = vmul.f32 %v2068_v36, %v2396_v7 }
 0x12d   : > { %v1548_v42 = vadd.f32 %v2401_v10, %v1509_v38  ;;  %v1510_v43 = vmul.f32 %v2069_v39, %v2396_v7 }
 0x12e   : > { %v1582_v44 = vmax.f32 %v1550_v40, 0.0  ;;  %v1551_v45 = vadd.f32 %v2401_v10, %v1512_v41 }
 0x12f   : > { %v2004_v46 = vpop.f32.mrb[20].mxu1  ;;  %v1580_v47 = vmax.f32 %v1548_v42, 0.0  ;;  %v1549_v48 = vadd.f32 %v2401_v10, %v1510_v43  ;;  %v2038_v49 = vpop.f32.mrb[20].mxu0 }
 0x130   : > { %v882_v50 = vpop.f32.mrb[21].mxu1  ;;  %1614 = vst [vmem:[%s2411_s10 + $0x90] sm:$0xff] %v1582_v44  ;;  %v1583_v51 = vmax.f32 %v1551_v45, 0.0  ;;  %v2070_v52 = vadd.f32 %v2038_v49, %v2004_v46  ;;  %v1311_v53 = vpop.f32.mrb[21].mxu0 }
 0x131   : > { %v2005_v54 = vpop.f32.mrb[22].mxu1  ;;  %1612 = vst [vmem:[%s2411_s10 + $0x80] sm:$0xff] %v1580_v47  ;;  %v1581_v55 = vmax.f32 %v1549_v48, 0.0  ;;  %v2071_v56 = vadd.f32 %v1311_v53, %v882_v50  ;;  %v2039_v57 = vpop.f32.mrb[22].mxu0 }
 0x132   : > { %v885_v58 = vpop.f32.mrb[23].mxu1  ;;  %1615 = vst [vmem:[%s2411_s10 + $0x98] sm:$0xff] %v1583_v51  ;;  %v1515_v59 = vmul.f32 %v2070_v52, %v2396_v7  ;;  %v2072_v60 = vadd.f32 %v2039_v57, %v2005_v54  ;;  %v1314_v61 = vpop.f32.mrb[23].mxu0 }
 0x133   : > { %1613 = vst [vmem:[%s2411_s10 + $0x88] sm:$0xff] %v1581_v55  ;;  %v1513_v62 = vmul.f32 %v2071_v56, %v2396_v7  ;;  %v2073_v63 = vadd.f32 %v1314_v61, %v885_v58 }
 0x134   : > { %v1554_v0 = vadd.f32 %v2401_v10, %v1515_v59  ;;  %v1516_v6 = vmul.f32 %v2072_v60, %v2396_v7 }
 0x135   : > { %v1552_v8 = vadd.f32 %v2401_v10, %v1513_v62  ;;  %v1514_v9 = vmul.f32 %v2073_v63, %v2396_v7 }
 0x136   : > { %v1586_v1 = vmax.f32 %v1554_v0, 0.0  ;;  %v1555_v11 = vadd.f32 %v2401_v10, %v1516_v6 }
 0x137   : > { %v2008_v12 = vpop.f32.mrb[24].mxu1  ;;  %v1584_v13 = vmax.f32 %v1552_v8, 0.0  ;;  %v1553_v14 = vadd.f32 %v2401_v10, %v1514_v9  ;;  %v2042_v15 = vpop.f32.mrb[24].mxu0 }
 0x138   : > { %v898_v16 = vpop.f32.mrb[25].mxu1  ;;  %1618 = vst [vmem:[%s2411_s10 + $0xb0] sm:$0xff] %v1586_v1  ;;  %v1587_v17 = vmax.f32 %v1555_v11, 0.0  ;;  %v2074_v18 = vadd.f32 %v2042_v15, %v2008_v12  ;;  %v1327_v19 = vpop.f32.mrb[25].mxu0 }
 0x139   : > { %v2009_v2 = vpop.f32.mrb[26].mxu1  ;;  %1616 = vst [vmem:[%s2411_s10 + $0xa0] sm:$0xff] %v1584_v13  ;;  %v1585_v20 = vmax.f32 %v1553_v14, 0.0  ;;  %v2075_v3 = vadd.f32 %v1327_v19, %v898_v16  ;;  %v2043_v21 = vpop.f32.mrb[26].mxu0 }
 0x13a   : > { %v901_v22 = vpop.f32.mrb[27].mxu1  ;;  %1619 = vst [vmem:[%s2411_s10 + $0xb8] sm:$0xff] %v1587_v17  ;;  %v1519_v23 = vmul.f32 %v2074_v18, %v2396_v7  ;;  %v2076_v4 = vadd.f32 %v2043_v21, %v2009_v2  ;;  %v1330_v24 = vpop.f32.mrb[27].mxu0 }
 0x13b   : > { %1617 = vst [vmem:[%s2411_s10 + $0xa8] sm:$0xff] %v1585_v20  ;;  %v1517_v25 = vmul.f32 %v2075_v3, %v2396_v7  ;;  %v2077_v26 = vadd.f32 %v1330_v24, %v901_v22 }
 0x13c   : > { %v1558_v5 = vadd.f32 %v2401_v10, %v1519_v23  ;;  %v1520_v27 = vmul.f32 %v2076_v4, %v2396_v7 }
 0x13d   : > { %v1556_v28 = vadd.f32 %v2401_v10, %v1517_v25  ;;  %v1518_v29 = vmul.f32 %v2077_v26, %v2396_v7 }
 0x13e   : > { %v1590_v30 = vmax.f32 %v1558_v5, 0.0  ;;  %v1559_v31 = vadd.f32 %v2401_v10, %v1520_v27 }
 0x13f   : > { %v2012_v32 = vpop.f32.mrb[28].mxu1  ;;  %v1588_v33 = vmax.f32 %v1556_v28, 0.0  ;;  %v1557_v34 = vadd.f32 %v2401_v10, %v1518_v29  ;;  %v2046_v35 = vpop.f32.mrb[28].mxu0 }
 0x140   : > { %v914_v36 = vpop.f32.mrb[29].mxu1  ;;  %1622 = vst [vmem:[%s2411_s10 + $0xd0] sm:$0xff] %v1590_v30  ;;  %v1591_v37 = vmax.f32 %v1559_v31, 0.0  ;;  %v2078_v38 = vadd.f32 %v2046_v35, %v2012_v32  ;;  %v1343_v39 = vpop.f32.mrb[29].mxu0 }
 0x141   : > { %v2013_v40 = vpop.f32.mrb[30].mxu1  ;;  %1620 = vst [vmem:[%s2411_s10 + $0xc0] sm:$0xff] %v1588_v33  ;;  %v1589_v41 = vmax.f32 %v1557_v34, 0.0  ;;  %v2079_v42 = vadd.f32 %v1343_v39, %v914_v36  ;;  %v2047_v43 = vpop.f32.mrb[30].mxu0 }
 0x142   : > { %v917_v44 = vpop.f32.mrb[31].mxu1  ;;  %1623 = vst [vmem:[%s2411_s10 + $0xd8] sm:$0xff] %v1591_v37  ;;  %v1523_v45 = vmul.f32 %v2078_v38, %v2396_v7  ;;  %v2080_v46 = vadd.f32 %v2047_v43, %v2013_v40  ;;  %v1346_v47 = vpop.f32.mrb[31].mxu0 }
 0x143   : > { %1621 = vst [vmem:[%s2411_s10 + $0xc8] sm:$0xff] %v1589_v41  ;;  %v1521_v48 = vmul.f32 %v2079_v42, %v2396_v7  ;;  %v2081_v49 = vadd.f32 %v1346_v47, %v917_v44 }
 0x144   : > { %v1562_v50 = vadd.f32 %v2401_v10, %v1523_v45  ;;  %v1524_v51 = vmul.f32 %v2080_v46, %v2396_v7 }
 0x145   : > { %v1560_v52 = vadd.f32 %v2401_v10, %v1521_v48  ;;  %v1522_v53 = vmul.f32 %v2081_v49, %v2396_v7 }
 0x146   : > { %v1594_v54 = vmax.f32 %v1562_v50, 0.0  ;;  %v1563_v55 = vadd.f32 %v2401_v10, %v1524_v51 }
 0x147   : > { %v1592_v56 = vmax.f32 %v1560_v52, 0.0  ;;  %v1561_v57 = vadd.f32 %v2401_v10, %v1522_v53 }
 0x148   : > { %1626 = vst [vmem:[%s2411_s10 + $0xf0] sm:$0xff] %v1594_v54  ;;  %v1595_v58 = vmax.f32 %v1563_v55, 0.0 }
 0x149   : > { %1624 = vst [vmem:[%s2411_s10 + $0xe0] sm:$0xff] %v1592_v56  ;;  %v1593_v59 = vmax.f32 %v1561_v57, 0.0 }
 0x14a   : > { %1627 = vst [vmem:[%s2411_s10 + $0xf8] sm:$0xff] %v1595_v58 }
 0x14b   : > { %1625 = vst [vmem:[%s2411_s10 + $0xe8] sm:$0xff] %v1593_v59 }
 0x14c PF: > { %s14_s17 = sadd.s32 1, %s2216_s17   ;;  %s2525_s15 = smov %s2212_s16 }
 0x14d   : > { %p11_p5 = scmp.ge.s32.totalorder %s14_s17, 4   ;;  %s2526_s16 = smov %s2528_s18 }
 0x14f   :  { %13 = sbr.rel (!%p11_p5) target bundleno = 2 (0x2), region = 70 }

</bundles_post_ra>
